<compile_context>
chip_gen: v7x
topology: tpu7x:2x2x1
jax: 0.10.0
libtpu: 0.0.40
codegen_flags: <defaults>
</compile_context>

<pallas_src>
import functools

import jax
import jax.numpy as jnp
from jax import lax
from jax.experimental import pallas as pl
from jax.experimental.pallas import tpu as pltpu


def _mcls_loss_kernel(pred_ref, tgt_ref, loss_ref, corr_ref, *, n_rows):
    i = pl.program_id(0)

    x = pred_ref[...].astype(jnp.float32)        # (TB, C) — cast on VPU, not in HBM
    tgt = tgt_ref[...]                           # (TB, 1) int32
    tb, c = x.shape

    # valid-row mask for the (possibly partial) last batch tile; out-of-range rows
    # may hold garbage (even NaN) but every use below is select-based, so it cannot
    # propagate.
    row_ids = lax.broadcasted_iota(jnp.int32, (tb, 1), 0) + i * tb
    valid = row_ids < n_rows                     # (TB, 1) bool

    # --- cross-entropy: logsumexp - target logit (numerically stable) ---
    m = jnp.max(x, axis=-1, keepdims=True)                                   # (TB, 1)
    lse = m + jnp.log(jnp.sum(jnp.exp(x - m), axis=-1, keepdims=True))       # (TB, 1)

    col_ids = lax.broadcasted_iota(jnp.int32, (tb, c), 1)                    # (TB, C)
    tgt_logit = jnp.sum(jnp.where(col_ids == tgt, x, 0.0),
                        axis=-1, keepdims=True)                              # (TB, 1)

    per_row_loss = jnp.where(valid, lse - tgt_logit, 0.0)                    # (TB, 1)

    # --- accuracy folded into existing quantities: row correct iff target logit
    # equals the row max (see tie TODO at the top).
    correct = jnp.where(valid & (tgt_logit == m), 1.0, 0.0)                  # (TB, 1)

    # per-tile partial sums, written as lane-dense (8,128) blocks (unmasked stores);
    # the wrapper reduces over tiles and applies 1/B and *100.
    loss_tile = jnp.sum(per_row_loss, axis=0, keepdims=True)                 # (1, 1)
    corr_tile = jnp.sum(correct, axis=0, keepdims=True)                      # (1, 1)
    loss_ref[...] = jnp.broadcast_to(loss_tile[None], loss_ref.shape)
    corr_ref[...] = jnp.broadcast_to(corr_tile[None], corr_ref.shape)


def multiclass_classification_loss(pred, targets, *, block_rows=None):
    """pred: (B, C) float logits (any float dtype); targets: (B,) or (B,1) int ids."""
    B, C = pred.shape
    targets = targets.reshape(-1).astype(jnp.int32)        # torch: squeeze().long()
    tgt2d = targets.reshape(B, 1)

    itemsize = jnp.dtype(pred.dtype).itemsize
    lanes = ((C + 127) // 128) * 128          # physical lane footprint per row in VMEM

    # batch tile sized by bytes: ~2 MiB of logits per pipeline buffer (double-buffered
    # by Pallas). Safe across v5e/v6e/v7x given the f32 in-kernel intermediates.
    if block_rows is None:
        target_bytes = 2 << 20
        block_rows = max(8, (target_bytes // (lanes * itemsize)) // 8 * 8)
    if block_rows >= B:
        block_rows = B
    else:
        block_rows = max(8, (block_rows // 8) * 8)          # keep sublane-aligned
    num_tiles = pl.cdiv(B, block_rows)

    # explicit scoped-VMEM budget: 2x double-buffered input blocks + headroom for the
    # f32 tile intermediates; capped under v7x's 64 MiB physical VMEM per TensorCore.
    in_buf = block_rows * lanes * itemsize
    f32_tile = block_rows * lanes * 4
    vmem_limit = int(min(56 << 20,
                         max(16 << 20, 2 * in_buf + 6 * f32_tile + (2 << 20))))

    kernel = functools.partial(_mcls_loss_kernel, n_rows=B)
    loss_parts, corr_parts = pl.pallas_call(
        kernel,
        out_shape=(
            jax.ShapeDtypeStruct((num_tiles, 8, 128), jnp.float32),
            jax.ShapeDtypeStruct((num_tiles, 8, 128), jnp.float32),
        ),
        grid=(num_tiles,),
        in_specs=[
            pl.BlockSpec((block_rows, C), lambda i: (i, 0)),   # full C: no pad copy
            pl.BlockSpec((block_rows, 1), lambda i: (i, 0)),
        ],
        out_specs=(
            pl.BlockSpec((1, 8, 128), lambda i: (i, 0, 0)),
            pl.BlockSpec((1, 8, 128), lambda i: (i, 0, 0)),
        ),
        compiler_params=pltpu.CompilerParams(
            # per-tile outputs are independent -> batch axis is parallel
            # (v7x megacore shards the tile stream across both TensorCores)
            dimension_semantics=("parallel",),
            vmem_limit_bytes=vmem_limit,
        ),
    )(pred, tgt2d)

    inv_b = 1.0 / B
    loss = jnp.sum(loss_parts[:, 0, 0]) * inv_b
    acc = jnp.sum(corr_parts[:, 0, 0]) * (100.0 * inv_b)
    return loss, acc


def _reference(pred, targets):
    # pure-JAX reference for sanity checking (torch CrossEntropyLoss 'mean' + argmax acc)
    logp = jax.nn.log_softmax(pred.astype(jnp.float32), axis=-1)
    B = pred.shape[0]
    targets = targets.reshape(-1)
    loss = -jnp.mean(logp[jnp.arange(B), targets])
    acc = 100.0 * jnp.sum(jnp.argmax(pred.astype(jnp.float32), axis=-1) == targets) / B
    return loss, acc.astype(jnp.float32)


if __name__ == "__main__":
    key = jax.random.PRNGKey(0)
    k1, k2, k3, k4, k5, k6 = jax.random.split(key, 6)

    # case 1: f32, C=32 (non-128 lane count, no wrapper pad), forced 8-row tiles ->
    # 3 tiles with a partial last tile (row masking)
    B1, C1 = 20, 32
    pred1 = jax.random.normal(k1, (B1, C1), dtype=jnp.float32)
    tgt1 = jax.random.randint(k2, (B1,), 0, C1, dtype=jnp.int32)
    loss1, acc1 = multiclass_classification_loss(pred1, tgt1, block_rows=8)
    jax.block_until_ready((loss1, acc1))
    ref_loss1, ref_acc1 = _reference(pred1, tgt1)
    assert jnp.allclose(loss1, ref_loss1, rtol=1e-5, atol=1e-5), (loss1, ref_loss1)
    assert jnp.allclose(acc1, ref_acc1, rtol=1e-5, atol=1e-5), (acc1, ref_acc1)

    # case 2: bf16 logits streamed natively, lane-aligned C, auto tile size (single
    # tile). One clearly-separated winner logit per row -> no float ties possible.
    B2, C2 = 16, 256
    base = jax.random.normal(k3, (B2, C2), dtype=jnp.float32)
    tgt2 = jax.random.randint(k4, (B2,), 0, C2, dtype=jnp.int32)
    rows = jnp.arange(B2)
    winners = jnp.where(rows % 2 == 0, tgt2, (tgt2 + 7) % C2)
    pred2 = base.at[rows, winners].add(12.0).astype(jnp.bfloat16)
    loss2, acc2 = multiclass_classification_loss(pred2, tgt2)
    jax.block_until_ready((loss2, acc2))
    ref_loss2, ref_acc2 = _reference(pred2, tgt2)
    assert jnp.allclose(loss2, ref_loss2, rtol=1e-4, atol=1e-4), (loss2, ref_loss2)
    assert jnp.allclose(acc2, ref_acc2, rtol=1e-5, atol=1e-5), (acc2, ref_acc2)

    # case 3: f32, unaligned C=200, multi-tile with a partial last tile
    B3, C3 = 37, 200
    pred3 = jax.random.normal(k5, (B3, C3), dtype=jnp.float32)
    tgt3 = jax.random.randint(k6, (B3,), 0, C3, dtype=jnp.int32)
    loss3, acc3 = multiclass_classification_loss(pred3, tgt3, block_rows=16)
    jax.block_until_ready((loss3, acc3))
    ref_loss3, ref_acc3 = _reference(pred3, tgt3)
    assert jnp.allclose(loss3, ref_loss3, rtol=1e-5, atol=1e-5), (loss3, ref_loss3)
    assert jnp.allclose(acc3, ref_acc3, rtol=1e-5, atol=1e-5), (acc3, ref_acc3)

    print("KERNEL_OK")
</pallas_src>

<mosaic_0001>
module attributes {stable_mosaic.version = 11 : i64} {
  func.func @_mcls_loss_kernel(%arg0: i32, %arg1: memref<8x32xf32, #tpu.memory_space<vmem>>, %arg2: memref<8x1xi32, #tpu.memory_space<vmem>>, %arg3: memref<1x8x128xf32, #tpu.memory_space<vmem>>, %arg4: memref<1x8x128xf32, #tpu.memory_space<vmem>>) attributes {dimension_semantics = [#tpu.dimension_semantics<parallel>], iteration_bounds = array<i64: 3>, scalar_prefetch = 0 : i64, scratch_operands = 0 : i64, tpu.core_type = #tpu.core_type<tc>, window_params = [{transform_indices = @transform_0, window_bounds = array<i64: 8, 32>}, {transform_indices = @transform_1, window_bounds = array<i64: 8, 1>}, {transform_indices = @transform_2, window_bounds = array<i64: 1, 8, 128>}, {transform_indices = @transform_3, window_bounds = array<i64: 1, 8, 128>}]} {
    %c0 = arith.constant 0 : index
    %c0_0 = arith.constant 0 : index
    %0 = vector.load %arg1[%c0, %c0_0] : memref<8x32xf32, #tpu.memory_space<vmem>>, vector<8x32xf32>
    %c0_1 = arith.constant 0 : index
    %c0_2 = arith.constant 0 : index
    %1 = vector.load %arg2[%c0_1, %c0_2] : memref<8x1xi32, #tpu.memory_space<vmem>>, vector<8x1xi32>
    %2 = tpu.iota {dimensions = array<i32: 0>} : vector<8x1xi32>
    %c8_i32 = arith.constant 8 : i32
    %3 = arith.muli %arg0, %c8_i32 : i32
    %4 = vector.broadcast %3 : i32 to vector<8x1xi32>
    %5 = arith.addi %2, %4 : vector<8x1xi32>
    %c20_i32 = arith.constant 20 : i32
    %6 = vector.broadcast %c20_i32 : i32 to vector<8x1xi32>
    %7 = arith.cmpi slt, %5, %6 : vector<8x1xi32>
    %cst = arith.constant dense<0xFF800000> : vector<8xf32>
    %8 = vector.multi_reduction <maximumf>, %0, %cst [1] : vector<8x32xf32> to vector<8xf32>
    %9 = vector.shape_cast %8 : vector<8xf32> to vector<8x1xf32>
    %10 = vector.broadcast %9 : vector<8x1xf32> to vector<8x32xf32>
    %11 = arith.subf %0, %10 : vector<8x32xf32>
    %12 = math.exp %11 : vector<8x32xf32>
    %cst_3 = arith.constant dense<0.000000e+00> : vector<8xf32>
    %13 = vector.multi_reduction <add>, %12, %cst_3 [1] : vector<8x32xf32> to vector<8xf32>
    %14 = vector.shape_cast %13 : vector<8xf32> to vector<8x1xf32>
    %15 = math.log %14 : vector<8x1xf32>
    %16 = arith.addf %9, %15 : vector<8x1xf32>
    %17 = tpu.iota {dimensions = array<i32: 1>} : vector<8x32xi32>
    %18 = vector.broadcast %1 : vector<8x1xi32> to vector<8x32xi32>
    %19 = arith.cmpi eq, %17, %18 : vector<8x32xi32>
    %cst_4 = arith.constant 0.000000e+00 : f32
    %20 = vector.broadcast %cst_4 : f32 to vector<8x32xf32>
    %21 = arith.select %19, %0, %20 : vector<8x32xi1>, vector<8x32xf32>
    %cst_5 = arith.constant dense<0.000000e+00> : vector<8xf32>
    %22 = vector.multi_reduction <add>, %21, %cst_5 [1] : vector<8x32xf32> to vector<8xf32>
    %23 = vector.shape_cast %22 : vector<8xf32> to vector<8x1xf32>
    %24 = arith.subf %16, %23 : vector<8x1xf32>
    %cst_6 = arith.constant 0.000000e+00 : f32
    %25 = vector.broadcast %cst_6 : f32 to vector<8x1xf32>
    %26 = arith.select %7, %24, %25 : vector<8x1xi1>, vector<8x1xf32>
    %27 = arith.cmpf oeq, %23, %9 : vector<8x1xf32>
    %28 = arith.andi %7, %27 : vector<8x1xi1>
    %cst_7 = arith.constant 1.000000e+00 : f32
    %cst_8 = arith.constant 0.000000e+00 : f32
    %29 = vector.broadcast %cst_7 : f32 to vector<8x1xf32>
    %30 = vector.broadcast %cst_8 : f32 to vector<8x1xf32>
    %31 = arith.select %28, %29, %30 : vector<8x1xi1>, vector<8x1xf32>
    %cst_9 = arith.constant dense<0.000000e+00> : vector<1xf32>
    %32 = vector.multi_reduction <add>, %26, %cst_9 [0] : vector<8x1xf32> to vector<1xf32>
    %33 = vector.shape_cast %32 : vector<1xf32> to vector<1x1xf32>
    %cst_10 = arith.constant dense<0.000000e+00> : vector<1xf32>
    %34 = vector.multi_reduction <add>, %31, %cst_10 [0] : vector<8x1xf32> to vector<1xf32>
    %35 = vector.shape_cast %34 : vector<1xf32> to vector<1x1xf32>
    %36 = vector.shape_cast %33 : vector<1x1xf32> to vector<1x1x1xf32>
    %37 = vector.shape_cast %36 : vector<1x1x1xf32> to vector<1x1x1xf32>
    %38 = vector.broadcast %37 : vector<1x1x1xf32> to vector<1x8x128xf32>
    %c0_11 = arith.constant 0 : index
    %c0_12 = arith.constant 0 : index
    %c0_13 = arith.constant 0 : index
    %39 = vector.load %arg3[%c0_11, %c0_12, %c0_13] : memref<1x8x128xf32, #tpu.memory_space<vmem>>, vector<1x8x128xf32>
    tpu.vector_store %arg3[%c0_11, %c0_12, %c0_13], %38 {strides = array<i32>} : memref<1x8x128xf32, #tpu.memory_space<vmem>>, vector<1x8x128xf32>,
    %40 = vector.shape_cast %35 : vector<1x1xf32> to vector<1x1x1xf32>
    %41 = vector.shape_cast %40 : vector<1x1x1xf32> to vector<1x1x1xf32>
    %42 = vector.broadcast %41 : vector<1x1x1xf32> to vector<1x8x128xf32>
    %c0_14 = arith.constant 0 : index
    %c0_15 = arith.constant 0 : index
    %c0_16 = arith.constant 0 : index
    %43 = vector.load %arg4[%c0_14, %c0_15, %c0_16] : memref<1x8x128xf32, #tpu.memory_space<vmem>>, vector<1x8x128xf32>
    tpu.vector_store %arg4[%c0_14, %c0_15, %c0_16], %42 {strides = array<i32>} : memref<1x8x128xf32, #tpu.memory_space<vmem>>, vector<1x8x128xf32>,
    return
  }
  func.func @transform_0(%arg0: i32) -> (i32, i32) {
    %c0_i32 = arith.constant 0 : i32
    %c0_i32_0 = arith.constant 0 : i32
    return %arg0, %c0_i32 : i32, i32
  }
  func.func @transform_1(%arg0: i32) -> (i32, i32) {
    %c0_i32 = arith.constant 0 : i32
    %c0_i32_0 = arith.constant 0 : i32
    return %arg0, %c0_i32 : i32, i32
  }
  func.func @transform_2(%arg0: i32) -> (i32, i32, i32) {
    %c0_i32 = arith.constant 0 : i32
    %c0_i32_0 = arith.constant 0 : i32
    %c0_i32_1 = arith.constant 0 : i32
    return %arg0, %c0_i32, %c0_i32_0 : i32, i32, i32
  }
  func.func @transform_3(%arg0: i32) -> (i32, i32, i32) {
    %c0_i32 = arith.constant 0 : i32
    %c0_i32_0 = arith.constant 0 : i32
    %c0_i32_1 = arith.constant 0 : i32
    return %arg0, %c0_i32, %c0_i32_0 : i32, i32, i32
  }
}

</mosaic_0001>

<bundles_post_ra>
// kernel: tpu_custom_call.1
= control target key start
LH: loop header
LB: loop body
LE: loop exit
PB: predicated region body
PF: predicated region fallthrough
CT: control target
= control target key end

     0   :  { %9 = vsyncpa [#allocation3], 0  ;;  %s715_s0 = inlined_call_operand.vmem [shape: f32[20,32], index: 0, kind: input, shape index: {}]   ;;  %s716_s1 = inlined_call_operand.vmem [shape: s32[20,1], index: 1, kind: input, shape index: {}]   ;;  %s717_s2 = inlined_call_operand.hbm [shape: f32[3,8,128], index: 2, kind: output, shape index: {0}]   ;;  %s718_s3 = inlined_call_operand.hbm [shape: f32[3,8,128], index: 3, kind: output, shape index: {1}]  }
   0x1   :  { %11 = vsyncpa [#allocation3 + $0x1], 0 }
   0x2   :  { %12 = vsyncpa [#allocation5], 0 }
   0x3   :  { %14 = vsyncpa [#allocation5 + $0x1], 0  ;;  %s565_s12 = smov 0   ;;  %s567_s13 = smov 0  }
   0x4   :  { %s569_s14 = smov 0   ;;  %s571_s15 = smov 0  }
   0x5 LB: > { %s586_s16 = sadd.s32 4294967295, %s539_s15   ;;  %s379_s17 = sadd.s32 4294967294, %s539_s15   ;;  %s539_s15 = sphi %s571_s15, %s724_s15   ;;  %s535_s14 = sphi %s569_s14, %s723_s14   ;;  %s531_s13 = sphi %s567_s13, %s722_s13   ;;  %s527_s12 = sphi %s565_s12, %s721_s12  }
   0x6   : > { %s590_s18 = sadd.s32 1, %s539_s15   ;;  %s79_s19 = sadd.s32 1, %s535_s14 }
   0x7   : > { %s76_s20 = ssub.s32 %s539_s15, %s590_s18  ;;  %p89_p0 = scmp.ne.s32.totalorder %s535_s14, %s531_s13 }
   0x8   : > { %p77_p1 = scmp.eq.s32.totalorder %s76_s20, 0  ;;  %p90_p2 = scmp.eq.s32.totalorder %s586_s16, 2 }
   0x9   : > { %p95_p3 = scmp.ne.s32.totalorder %s531_s13, %s527_s12  ;;  %p96_p4 = scmp.eq.s32.totalorder %s379_s17, 2 }
   0xa   : > { %s601_s21 = scalar_select %p77_p1, %s535_s14, %s79_s19  }
   0xb   : > { %p603_p5 = por %p90_p2, %p89_p0  ;;  %p607_p6 = por %p96_p4, %p95_p3 }
   0xc   : > { %p382_p7 = scmp.ge.s32.totalorder %s539_s15, 1  ;;  %p154_p8 = scmp.lt.s32.totalorder %s539_s15, 4 }
   0xe   : > { %p155_p9 = pnand %p382_p7, %p154_p8 }
   0xf   : > { %p186_p10 = scmp.lt.s32.totalorder (!%p155_p9), %s586_s16, 2  ;;  %v541_v0 = vmov (!%p155_p9), 0   ;;  %vm202_vm0 = vcmask (!%p155_p9), 261120   ;;  %v196_v7 = vlaneseq (!%p155_p9)  ;;  %s387_s5 = sshll.u32 (!%p155_p9), %s586_s16, 3  ;;  %v542_v19 = vmov (!%p155_p9), 0.0  }
  0x10   : > { %158 = sbr.rel (%p155_p9) target bundleno = 387 (0x183), region = 28  ;;  %440 = vset.pattern.permute.xlu0 (!%p155_p9), %v541_v0  ;;  %v199_v15 = vstv (!%p155_p9), %s387_s5  ;;  %s627_s6 = sand.u32 (!%p155_p9), 1, %s531_s13  }
  0x11   : > { %v216_v8 = vand.u32 (!%p155_p9), 127, %v196_v7  ;;  %v197_v14 = vshrl.u32 (!%p155_p9), %v196_v7, 7  ;;  %s383_s7 = sshll.u32 (!%p155_p9), %s627_s6, 3  ;;  %s390_s8 = sshll.u32 (!%p155_p9), %s586_s16, 7 }
  0x12   : > { %s185_s9 = scalar_lea.vmem (!%p155_p9), [#allocation4], %s383_s7  ;;  %s639_s19 = scalar_lea.hbm (!%p155_p9), %s718_s3, %s390_s8 }
  0x13   : > { %v200_v16 = vadd.s32 (!%p155_p9), %v199_v15, %v197_v14  ;;  %s276_s10 = sshll.u32 (!%p155_p9), %s185_s9, 4  ;;  %s250_s20 = scalar_lea.sflag (!%p155_p9), [#allocation5], %s627_s6  ;;  %s641_s10 = int_to_ptr.vmem [resolvable:$true] %s276_s10 }
  0x15   : > { %vm201_vm2 = vcmp.lt.s32.totalorder (!%p155_p9), %v200_v16, 20 }
  0x17   : > { %s187_s24 = scalar_select %p186_p10, %s586_s16, 2 }
  0x19   : > { %s385_s25 = sshll.u32 %s187_s24, 3  ;;  %s445_s24 = scalar_lea.vmem %s641_s10, 128 }
  0x1a   : > { %s189_s28 = scalar_lea.vmem %s715_s0, %s385_s25  ;;  %s193_s4 = scalar_lea.vmem %s716_s1, %s385_s25 }
  0x1b   : > { %v194_v1 = vld [vmem:[%s189_s28] sm:$0xff]  ;;  %p446_p11 = scmp.ne.s32.totalorder %s641_s10, %s445_s24  ;;  %s543_s25 = smov [#allocation4]  }
  0x1c   : > { %v203_v2 = vsel %vm202_vm0, %v194_v1, -inf  ;;  %v195_v3 = vld [vmem:[%s193_s4] sm:$0xff]  ;;  %s449_s26 = sshll.u32 %s543_s25, 4  ;;  %s450_s26 = int_to_ptr.vmem [resolvable:$false] %s449_s26 }
  0x1d   : > { %204 = vmax.xlane.f32.xlu0 %v203_v2  ;;  %p447_p12 = pnand %p446_p11, %p603_p5  ;;  %s451_s27 = scalar_lea.vmem %s450_s26, 256 }
  0x1e   : > { %p452_p0 = scmp.lt.s32.totalorder %s641_s10, %s450_s26  ;;  %p453_p1 = scmp.lt.s32.totalorder %s451_s27, %s445_s24 }
  0x1f   : > { %p448_p13 = pneg %p447_p12 }
  0x20   : > { %p454_p2 = por %p453_p1, %p452_p0 }
  0x22   : > { %p455_p3 = pnand %p454_p2, %p448_p13 }
  0x33   : > { %218 = vperm.xlu0 %440, %v195_v3  }
  0xaa   : > { %v205_v4 = vpop.xlane.xlu0 %204 }
  0xab   : > { %v206_v5 = vsub.f32 %v194_v1, %v205_v4 }
  0xad   : > { %v207_v6 = vmul.f32 1.442695, %v206_v5 }
  0xaf   : > { %441 = vpow2.f32 %v207_v6 }
  0xb2   : > { %v219_v9 = vpop.permute.xlu0 %218 }
  0xb3   : > { %vm220_vm1 = vcmp.eq.s32.totalorder %v216_v8, %v219_v9 }
  0xb4   : > { %v221_v11 = vsel %vm220_vm1, %v194_v1, 0.0 }
  0xb5   : > { %v222_v13 = vsel %vm202_vm0, %v221_v11, 0.0 }
  0xb9   : > { %v442_v10 = vpop.eup %441 }
  0xba   : > { %v209_v12 = vsel %vm202_vm0, %v442_v10, 0.0 }
  0xbb   : > { %210 = vadd.xlane.f32.xlu1 %v209_v12 }
  0xbf   : > { %223 = vadd.xlane.f32.xlu1 %v222_v13 }
 0x148   : > { %v211_v17 = vpop.xlane.xlu1 %210 }
 0x149   : > { %443 = vlog2.f32 %v211_v17 }
 0x14c   : > { %v224_v18 = vpop.xlane.xlu1 %223 }
 0x14d   : > { %vm227_vm3 = vcmp.eq.f32.partialorder %v224_v18, %v205_v4 }
 0x14e   : > { %vm228_vm4 = vmand %vm201_vm2, %vm227_vm3 }
 0x14f   : > { %v229_v20 = vsel %vm228_vm4, 1.0, %v542_v19 }
 0x150   : > { %v236_v21 = vrot.slane %v229_v20, 4 }
 0x152   : > { %v237_v22 = vadd.f32 %v236_v21, %v229_v20 }
 0x153   : > { %v444_v23 = vpop.eup %443 }
 0x154   : > { %v213_v24 = vmul.f32 0.6931472, %v444_v23  ;;  %v238_v25 = vrot.slane %v237_v22, 2 }
 0x156   : > { %v214_v26 = vadd.f32 %v213_v24, %v205_v4  ;;  %v239_v27 = vadd.f32 %v238_v25, %v237_v22 }
 0x158   : > { %v225_v28 = vsub.f32 %v214_v26, %v224_v18  ;;  %v240_v29 = vrot.slane %v239_v27, 1 }
 0x15a   : > { %v226_v30 = vsel %vm201_vm2, %v225_v28, 0.0  ;;  %v241_v31 = vadd.f32 %v240_v29, %v239_v27 }
 0x15b   : > { %v230_v32 = vrot.slane %v226_v30, 4 }
 0x15c   : > { %243 = vst [vmem:[%s185_s9] sm:$0xff] %v241_v31 }
 0x15d   : > { %v231_v33 = vadd.f32 %v230_v32, %v226_v30 }
 0x15e   : > { %458 = shalt.err (!%p455_p3)
}
 0x15f   : > { %s459_s28 = scalar_lea.hbm %s639_s19, 128  ;;  %s463_s4 = scalar_lea.hbm %s718_s3, 384 }
 0x160   : > { %p460_p4 = scmp.ne.s32.totalorder %s639_s19, %s459_s28  ;;  %p464_p9 = scmp.lt.u32.totalorder %s639_s19, %s718_s3 }
 0x161   : > { %p465_p10 = scmp.lt.u32.totalorder %s463_s4, %s459_s28  ;;  %p467_p12 = scmp.lt.u32.totalorder %s459_s28, %s639_s19 }
 0x162   : > { %p461_p7 = pnand %p460_p4, %p603_p5 }
 0x163   : > { %p466_p11 = por %p465_p10, %p464_p9 }
 0x164   : > { %p462_p8 = pneg %p461_p7 }
 0x165   : > { %p468_p13 = por %p467_p12, %p466_p11 }
 0x167   : > { %p469_p0 = pnand %p468_p13, %p462_p8 }
 0x169   : > { %472 = shalt.err (!%p469_p0)
}
 0x16a   : > { %395 = dma.vmem_to_hbm [thread:$0]  (%p603_p5), %s641_s10, 128, %s639_s19, %s250_s20   ;;  %v232_v34 = vrot.slane %v231_v33, 2 }
 0x16b   : > { %s178_s11 = scalar_lea.vmem [#allocation2], %s383_s7  ;;  %s672_s26 = scalar_lea.hbm %s717_s2, %s390_s8 }
 0x16c   : > { %v233_v35 = vadd.f32 %v232_v34, %v231_v33  ;;  %s263_s17 = sshll.u32 %s178_s11, 4  ;;  %s245_s10 = scalar_lea.sflag [#allocation3], %s627_s6  ;;  %s674_s17 = int_to_ptr.vmem [resolvable:$true] %s263_s17 }
 0x16d   : > { %s473_s19 = scalar_lea.vmem %s674_s17, 128  ;;  %s544_s7 = smov [#allocation2]  }
 0x16e   : > { %v234_v36 = vrot.slane %v233_v35, 1  ;;  %p474_p1 = scmp.ne.s32.totalorder %s674_s17, %s473_s19  ;;  %s477_s20 = sshll.u32 %s544_s7, 4  ;;  %s478_s20 = int_to_ptr.vmem [resolvable:$false] %s477_s20 }
 0x16f   : > { %s479_s16 = scalar_lea.vmem %s478_s20, 256  ;;  %p480_p4 = scmp.lt.s32.totalorder %s674_s17, %s478_s20 }
 0x170   : > { %v235_v37 = vadd.f32 %v234_v36, %v233_v35  ;;  %p475_p2 = pnand %p474_p1, %p603_p5  ;;  %p481_p7 = scmp.lt.s32.totalorder %s479_s16, %s473_s19 }
 0x172   : > { %242 = vst [vmem:[%s178_s11] sm:$0xff] %v235_v37  ;;  %p476_p3 = pneg %p475_p2  ;;  %p482_p8 = por %p481_p7, %p480_p4 }
 0x174   : > { %p483_p9 = pnand %p482_p8, %p476_p3 }
 0x176   : > { %486 = shalt.err (!%p483_p9)
}
 0x177   : > { %s487_s6 = scalar_lea.hbm %s672_s26, 128  ;;  %s491_s28 = scalar_lea.hbm %s717_s2, 384 }
 0x178   : > { %p488_p10 = scmp.ne.s32.totalorder %s672_s26, %s487_s6  ;;  %p492_p13 = scmp.lt.u32.totalorder %s672_s26, %s717_s2 }
 0x179   : > { %p493_p0 = scmp.lt.u32.totalorder %s491_s28, %s487_s6  ;;  %p495_p2 = scmp.lt.u32.totalorder %s487_s6, %s672_s26 }
 0x17a   : > { %p489_p11 = pnand %p488_p10, %p603_p5 }
 0x17b   : > { %p494_p1 = por %p493_p0, %p492_p13 }
 0x17c   : > { %p490_p12 = pneg %p489_p11 }
 0x17d   : > { %p496_p3 = por %p495_p2, %p494_p1 }
 0x17f   : > { %p497_p4 = pnand %p496_p3, %p490_p12 }
 0x181   : > { %500 = shalt.err (!%p497_p4)
}
 0x182   : > { %394 = dma.vmem_to_hbm [thread:$0]  (%p603_p5), %s674_s17, 128, %s672_s26, %s245_s10  }
 0x183 PF: > { %p405_p7 = scmp.ge.s32.totalorder %s539_s15, 2  ;;  %s288_s4 = sand.u32 1, %s527_s12  }
 0x184   : > { %s289_s5 = scalar_lea.sflag [#allocation3], %s288_s4 }
 0x185   : > { %p399_p8 = pnand %p405_p7, %p607_p6 }
 0x187   : > { %518 = dma.done.wait (!%p399_p8), %s289_s5, 128  }
 0x188   : > { %520 = vsyncadd (!%p399_p8), %s289_s5, 4294967168  ;;  %s298_s9 = scalar_lea.sflag [#allocation5], %s288_s4 }
 0x189   : > { %522 = dma.done.wait (!%p399_p8), %s298_s9, 128  }
 0x18a   : > { %524 = vsyncadd (!%p399_p8), %s298_s9, 4294967168  ;;  %p17_p5 = scmp.ge.s32.totalorder %s590_s18, 5   ;;  %s721_s12 = smov %s531_s13 }
 0x18b   : > { %s722_s13 = smov %s535_s14  ;;  %s723_s14 = smov %s601_s21 }
 0x18c   : > { %s724_s15 = smov %s590_s18  ;;  %19 = sbr.rel (!%p17_p5) target bundleno = 5 (0x5), region = 83 }
 0x193   :  { %303 = vsyncpa [#allocation3], 1 }
 0x194   :  { %305 = vsyncpa [#allocation3 + $0x1], 1 }
 0x195   :  { %306 = vsyncpa [#allocation5], 1 }
 0x196   :  { %308 = vsyncpa [#allocation5 + $0x1], 1 }

</bundles_post_ra>
